<compile_context>
chip_gen: v7x
topology: tpu7x:2x2x1
jax: 0.10.0
libtpu: 0.0.40
codegen_flags: <defaults>
</compile_context>

<pallas_src>
import functools

import jax
import jax.numpy as jnp
from jax.experimental import pallas as pl
from jax.experimental.pallas import tpu as pltpu

LOG_STD_MAX = 2.0
LOG_STD_MIN = -20.0


def _round_up(x: int, m: int) -> int:
    return ((x + m - 1) // m) * m


def _cdiv(a: int, b: int) -> int:
    return (a + b - 1) // b


def _gaussian_policy_kernel(obs_ref, w1_ref, b1_ref, w2_ref, b2_ref,
                            w3_ref, b3_ref, mean_ref):
    # All-f32 path: kernel is HBM-bound, f32 MXU passes cost nothing here and
    # keep parity with the PyTorch f32 reference.
    x = obs_ref[...]

    # Layer 1: Linear + bias + ReLU
    h1 = jnp.dot(x, w1_ref[...], preferred_element_type=jnp.float32)
    h1 = jnp.maximum(h1 + b1_ref[...], 0.0)

    # Layer 2: Linear + bias + ReLU
    h2 = jnp.dot(h1, w2_ref[...], preferred_element_type=jnp.float32)
    h2 = jnp.maximum(h2 + b2_ref[...], 0.0)

    # Output layer: Linear + bias + Tanh -> mean of the Normal distribution
    out = jnp.dot(h2, w3_ref[...], preferred_element_type=jnp.float32)
    mean_ref[...] = jnp.tanh(out + b3_ref[...])


def prepare_params(params):
    """One-time parameter prep, hoisted out of the per-call forward path."""
    return {
        "w1": params["w1"].astype(jnp.float32),
        "b1": params["b1"].astype(jnp.float32).reshape(1, -1),
        "w2": params["w2"].astype(jnp.float32),
        "b2": params["b2"].astype(jnp.float32).reshape(1, -1),
        "w3": params["w3"].astype(jnp.float32),
        "b3": params["b3"].astype(jnp.float32).reshape(1, -1),
        "log_std": params["log_std"].astype(jnp.float32),
    }


@functools.partial(jax.jit, static_argnames=("tile_b",))
def gaussian_policy_forward(obs, prepared, tile_b: int = 1024):
    """Returns (mean, std) of the Normal produced by GaussianPolicy.

    obs: (B, state_dim) float32
    prepared: output of prepare_params (w1 (S,H), b1 (1,H), w2 (H,H), b2 (1,H),
              w3 (H,A), b3 (1,A), log_std (A,))
    """
    obs = obs.astype(jnp.float32)
    B, S = obs.shape
    H = prepared["w1"].shape[1]
    A = prepared["w3"].shape[1]

    # Batch tile: 8-sublane aligned, >=2 grid steps when B allows it (so the
    # "parallel" grid axis engages both TensorCores on v7x), and tiles divide
    # the (at most lightly padded) batch exactly -> no wasted zero-row tiles.
    TB = max(8, min(tile_b, _round_up(_cdiv(B, 2), 8)))
    n_tiles = _cdiv(B, TB)
    B_pad = n_tiles * TB                      # pads B by < 8 rows per tile at most

    if B_pad != B:
        obs_in = jnp.zeros((B_pad, S), jnp.float32).at[:B].set(obs)
    else:
        obs_in = obs

    # Resident (non-streamed) blocks: full array, same block index every step.
    resident = lambda shape: pl.BlockSpec(shape, lambda i: (0, 0))

    flops = 2 * B_pad * (S * H + H * H + H * A)
    bytes_accessed = (
        B_pad * S * 4                              # obs stream in
        + (S * H + H * H + H * A) * 4              # f32 weights (resident)
        + (2 * H + A) * 4                          # f32 biases
        + B_pad * A * 4                            # mean stream out
    )
    cost = pl.CostEstimate(
        flops=flops, transcendentals=B_pad * A, bytes_accessed=bytes_accessed
    )

    mean_pad = pl.pallas_call(
        _gaussian_policy_kernel,
        out_shape=jax.ShapeDtypeStruct((B_pad, A), jnp.float32),
        grid=(n_tiles,),
        in_specs=[
            pl.BlockSpec((TB, S), lambda i: (i, 0)),   # obs: streamed tiles
            resident((S, H)),                          # w1
            resident((1, H)),                          # b1
            resident((H, H)),                          # w2
            resident((1, H)),                          # b2
            resident((H, A)),                          # w3
            resident((1, A)),                          # b3
        ],
        out_specs=pl.BlockSpec((TB, A), lambda i: (i, 0)),  # mean: streamed
        compiler_params=pltpu.CompilerParams(
            dimension_semantics=("parallel",),  # shards tiles across TCs on v7x
        ),
        cost_estimate=cost,
    )(obs_in, prepared["w1"], prepared["b1"], prepared["w2"], prepared["b2"],
      prepared["w3"], prepared["b3"])

    mean = mean_pad[:B] if B_pad != B else mean_pad
    # std is batch-independent: compute once in the wrapper (f32, exact).
    std = jnp.exp(jnp.clip(prepared["log_std"], LOG_STD_MIN, LOG_STD_MAX))
    return mean, std


def init_params(key, state_dim, act_dim, hidden_dim):
    """Deterministic synthetic init (Kaiming-uniform-ish like nn.Linear default)."""
    ks = jax.random.split(key, 6)

    def linear(kw, kb, fan_in, fan_out):
        bound = 1.0 / jnp.sqrt(fan_in)
        w = jax.random.uniform(kw, (fan_in, fan_out), jnp.float32, -bound, bound)
        b = jax.random.uniform(kb, (fan_out,), jnp.float32, -bound, bound)
        return w, b

    w1, b1 = linear(ks[0], ks[1], state_dim, hidden_dim)
    w2, b2 = linear(ks[2], ks[3], hidden_dim, hidden_dim)
    w3, b3 = linear(ks[4], ks[5], hidden_dim, act_dim)
    log_std = jnp.zeros((act_dim,), jnp.float32)  # nn.Parameter(torch.zeros(act_dim))
    return {"w1": w1, "b1": b1, "w2": w2, "b2": b2,
            "w3": w3, "b3": b3, "log_std": log_std}


def _reference_forward(obs, p):
    h1 = jnp.maximum(obs @ p["w1"] + p["b1"], 0.0)
    h2 = jnp.maximum(h1 @ p["w2"] + p["b2"], 0.0)
    mean = jnp.tanh(h2 @ p["w3"] + p["b3"])
    std = jnp.exp(jnp.clip(p["log_std"], LOG_STD_MIN, LOG_STD_MAX))
    return mean, std


if __name__ == "__main__":
    key = jax.random.PRNGKey(0)
    k_param, k_obs = jax.random.split(key)

    batch = 8
    state_dim = 16
    hidden_dim = 32
    act_dim = 4

    params = init_params(k_param, state_dim, act_dim, hidden_dim)
    prepared = prepare_params(params)  # hoisted one-time parameter prep
    obs = jax.random.normal(k_obs, (batch, state_dim), jnp.float32)

    mean, std = gaussian_policy_forward(obs, prepared)
    mean = jax.block_until_ready(mean)
    std = jax.block_until_ready(std)

    # sanity check vs pure-JAX f32 reference (f32 MXU path -> tight-ish tolerance)
    ref_mean, ref_std = _reference_forward(obs, params)
    assert mean.shape == (batch, act_dim) and std.shape == (act_dim,)
    assert jnp.allclose(mean, ref_mean, atol=2e-2, rtol=2e-2), "mean mismatch"
    assert jnp.allclose(std, ref_std, atol=1e-6, rtol=1e-6), "std mismatch"

    print("KERNEL_OK")
</pallas_src>

<mosaic_0001>
module attributes {stable_mosaic.version = 11 : i64} {
  func.func @_gaussian_policy_kernel(%arg0: i32, %arg1: memref<8x16xf32, #tpu.memory_space<vmem>>, %arg2: memref<16x32xf32, #tpu.memory_space<vmem>>, %arg3: memref<1x32xf32, #tpu.memory_space<vmem>>, %arg4: memref<32x32xf32, #tpu.memory_space<vmem>>, %arg5: memref<1x32xf32, #tpu.memory_space<vmem>>, %arg6: memref<32x4xf32, #tpu.memory_space<vmem>>, %arg7: memref<1x4xf32, #tpu.memory_space<vmem>>, %arg8: memref<8x4xf32, #tpu.memory_space<vmem>>) attributes {dimension_semantics = [#tpu.dimension_semantics<parallel>], iteration_bounds = array<i64: 1>, scalar_prefetch = 0 : i64, scratch_operands = 0 : i64, tpu.core_type = #tpu.core_type<tc>, window_params = [{transform_indices = @transform_0, window_bounds = array<i64: 8, 16>}, {pipeline_mode = #tpu.pipeline_mode<synchronous>, transform_indices = @transform_1, window_bounds = array<i64: 16, 32>}, {pipeline_mode = #tpu.pipeline_mode<synchronous>, transform_indices = @transform_2, window_bounds = array<i64: 1, 32>}, {pipeline_mode = #tpu.pipeline_mode<synchronous>, transform_indices = @transform_3, window_bounds = array<i64: 32, 32>}, {pipeline_mode = #tpu.pipeline_mode<synchronous>, transform_indices = @transform_4, window_bounds = array<i64: 1, 32>}, {pipeline_mode = #tpu.pipeline_mode<synchronous>, transform_indices = @transform_5, window_bounds = array<i64: 32, 4>}, {pipeline_mode = #tpu.pipeline_mode<synchronous>, transform_indices = @transform_6, window_bounds = array<i64: 1, 4>}, {transform_indices = @transform_7, window_bounds = array<i64: 8, 4>}]} {
    %c0 = arith.constant 0 : index
    %c0_0 = arith.constant 0 : index
    %0 = vector.load %arg1[%c0, %c0_0] : memref<8x16xf32, #tpu.memory_space<vmem>>, vector<8x16xf32>
    %c0_1 = arith.constant 0 : index
    %c0_2 = arith.constant 0 : index
    %1 = vector.load %arg2[%c0_1, %c0_2] : memref<16x32xf32, #tpu.memory_space<vmem>>, vector<16x32xf32>
    %cst = arith.constant dense<0.000000e+00> : vector<8x32xf32>
    %2 = tpu.matmul %0, %1, %cst {dimension_numbers = #tpu.dot_dimension_numbers<[1], [0], [0], [1], [0, 0, 1, 1], [], []>} : vector<8x16xf32>, vector<16x32xf32>, vector<8x32xf32> -> vector<8x32xf32>
    %c0_3 = arith.constant 0 : index
    %c0_4 = arith.constant 0 : index
    %3 = vector.load %arg3[%c0_3, %c0_4] : memref<1x32xf32, #tpu.memory_space<vmem>>, vector<1x32xf32>
    %4 = vector.broadcast %3 : vector<1x32xf32> to vector<8x32xf32>
    %5 = arith.addf %2, %4 : vector<8x32xf32>
    %cst_5 = arith.constant 0.000000e+00 : f32
    %6 = vector.broadcast %cst_5 : f32 to vector<8x32xf32>
    %7 = arith.maximumf %5, %6 : vector<8x32xf32>
    %c0_6 = arith.constant 0 : index
    %c0_7 = arith.constant 0 : index
    %8 = vector.load %arg4[%c0_6, %c0_7] : memref<32x32xf32, #tpu.memory_space<vmem>>, vector<32x32xf32>
    %cst_8 = arith.constant dense<0.000000e+00> : vector<8x32xf32>
    %9 = tpu.matmul %7, %8, %cst_8 {dimension_numbers = #tpu.dot_dimension_numbers<[1], [0], [0], [1], [0, 0, 1, 1], [], []>} : vector<8x32xf32>, vector<32x32xf32>, vector<8x32xf32> -> vector<8x32xf32>
    %c0_9 = arith.constant 0 : index
    %c0_10 = arith.constant 0 : index
    %10 = vector.load %arg5[%c0_9, %c0_10] : memref<1x32xf32, #tpu.memory_space<vmem>>, vector<1x32xf32>
    %11 = vector.broadcast %10 : vector<1x32xf32> to vector<8x32xf32>
    %12 = arith.addf %9, %11 : vector<8x32xf32>
    %cst_11 = arith.constant 0.000000e+00 : f32
    %13 = vector.broadcast %cst_11 : f32 to vector<8x32xf32>
    %14 = arith.maximumf %12, %13 : vector<8x32xf32>
    %c0_12 = arith.constant 0 : index
    %c0_13 = arith.constant 0 : index
    %15 = vector.load %arg6[%c0_12, %c0_13] : memref<32x4xf32, #tpu.memory_space<vmem>>, vector<32x4xf32>
    %cst_14 = arith.constant dense<0.000000e+00> : vector<8x4xf32>
    %16 = tpu.matmul %14, %15, %cst_14 {dimension_numbers = #tpu.dot_dimension_numbers<[1], [0], [0], [1], [0, 0, 1, 1], [], []>} : vector<8x32xf32>, vector<32x4xf32>, vector<8x4xf32> -> vector<8x4xf32>
    %c0_15 = arith.constant 0 : index
    %c0_16 = arith.constant 0 : index
    %17 = vector.load %arg7[%c0_15, %c0_16] : memref<1x4xf32, #tpu.memory_space<vmem>>, vector<1x4xf32>
    %18 = vector.broadcast %17 : vector<1x4xf32> to vector<8x4xf32>
    %19 = arith.addf %16, %18 : vector<8x4xf32>
    %20 = math.tanh %19 : vector<8x4xf32>
    %c0_17 = arith.constant 0 : index
    %c0_18 = arith.constant 0 : index
    %21 = vector.load %arg8[%c0_17, %c0_18] : memref<8x4xf32, #tpu.memory_space<vmem>>, vector<8x4xf32>
    tpu.vector_store %arg8[%c0_17, %c0_18], %20 {strides = array<i32>} : memref<8x4xf32, #tpu.memory_space<vmem>>, vector<8x4xf32>,
    return
  }
  func.func @transform_0(%arg0: i32) -> (i32, i32) {
    %c0_i32 = arith.constant 0 : i32
    %c0_i32_0 = arith.constant 0 : i32
    return %arg0, %c0_i32 : i32, i32
  }
  func.func @transform_1(%arg0: i32) -> (i32, i32) {
    %c0_i32 = arith.constant 0 : i32
    %c0_i32_0 = arith.constant 0 : i32
    %c0_i32_1 = arith.constant 0 : i32
    return %c0_i32, %c0_i32_0 : i32, i32
  }
  func.func @transform_2(%arg0: i32) -> (i32, i32) {
    %c0_i32 = arith.constant 0 : i32
    %c0_i32_0 = arith.constant 0 : i32
    %c0_i32_1 = arith.constant 0 : i32
    return %c0_i32, %c0_i32_0 : i32, i32
  }
  func.func @transform_3(%arg0: i32) -> (i32, i32) {
    %c0_i32 = arith.constant 0 : i32
    %c0_i32_0 = arith.constant 0 : i32
    %c0_i32_1 = arith.constant 0 : i32
    return %c0_i32, %c0_i32_0 : i32, i32
  }
  func.func @transform_4(%arg0: i32) -> (i32, i32) {
    %c0_i32 = arith.constant 0 : i32
    %c0_i32_0 = arith.constant 0 : i32
    %c0_i32_1 = arith.constant 0 : i32
    return %c0_i32, %c0_i32_0 : i32, i32
  }
  func.func @transform_5(%arg0: i32) -> (i32, i32) {
    %c0_i32 = arith.constant 0 : i32
    %c0_i32_0 = arith.constant 0 : i32
    %c0_i32_1 = arith.constant 0 : i32
    return %c0_i32, %c0_i32_0 : i32, i32
  }
  func.func @transform_6(%arg0: i32) -> (i32, i32) {
    %c0_i32 = arith.constant 0 : i32
    %c0_i32_0 = arith.constant 0 : i32
    %c0_i32_1 = arith.constant 0 : i32
    return %c0_i32, %c0_i32_0 : i32, i32
  }
  func.func @transform_7(%arg0: i32) -> (i32, i32) {
    %c0_i32 = arith.constant 0 : i32
    %c0_i32_0 = arith.constant 0 : i32
    return %arg0, %c0_i32 : i32, i32
  }
}

</mosaic_0001>

<bundles_post_ra>
// kernel: gaussian_policy_forward.1
= control target key start
LH: loop header
LB: loop body
LE: loop exit
PB: predicated region body
PF: predicated region fallthrough
CT: control target
= control target key end

     0   :  { %12 = vsyncpa [#allocation3], 0  ;;  %s398_s24 = smov [#allocation2]   ;;  %s498_s0 = inlined_call_operand.vmem [shape: f32[8,16], index: 0, kind: input, shape index: {}]   ;;  %s499_s1 = inlined_call_operand.hbm [shape: f32[16,32], index: 1, kind: input, shape index: {}]   ;;  %s500_s2 = inlined_call_operand.vmem [shape: f32[1,32], index: 2, kind: input, shape index: {}]   ;;  %s501_s3 = inlined_call_operand.vmem [shape: f32[32,32], index: 3, kind: input, shape index: {}]   ;;  %s502_s4 = inlined_call_operand.vmem [shape: f32[1,32], index: 4, kind: input, shape index: {}]   ;;  %s503_s5 = inlined_call_operand.vmem [shape: f32[32,4], index: 5, kind: input, shape index: {}]   ;;  %s504_s6 = inlined_call_operand.vmem [shape: f32[1,4], index: 6, kind: input, shape index: {}]   ;;  %s505_s7 = inlined_call_operand.vmem [shape: f32[8,4], index: 7, kind: output, shape index: {}]  }
   0x1   :  { %s20_s25 = sshll.u32 %s398_s24, 4  ;;  %s374_s28 = scalar_lea.hbm %s499_s1, 256  ;;  %s21_s25 = int_to_ptr.vmem [resolvable:$true] %s20_s25 }
   0x2   :  { %p375_p0 = scmp.ne.s32.totalorder %s499_s1, %s374_s28  ;;  %p378_p1 = scmp.lt.u32.totalorder %s374_s28, %s499_s1 }
   0x4   :  { %p380_p2 = pnand %p378_p1, %p375_p0 }
   0x6   :  { %383 = shalt.err (!%p380_p2)
}
   0x7   :  { %s384_s10 = scalar_lea.vmem %s21_s25, 256  ;;  %p389_p4 = scmp.lt.s32.totalorder %s21_s25, %s21_s25 }
   0x8   :  { %p385_p3 = scmp.ne.s32.totalorder %s21_s25, %s384_s10  ;;  %p390_p5 = scmp.lt.s32.totalorder %s384_s10, %s384_s10 }
   0xa   :  { %p391_p6 = por %p390_p5, %p389_p4 }
   0xc   :  { %p392_p7 = pnand %p391_p6, %p385_p3 }
   0xe   :  { %395 = shalt.err (!%p392_p7)
}
   0xf   :  { %s399_s11 = smov 128   ;;  %s400_s12 = smov 8  }
  0x10   :  { %26 = dma.hbm_to_vmem [thread:$0]  %s499_s1, 256, %s21_s25, [#allocation3], %s399_s11, %s399_s11, %s400_s12  }
  0x11   :  { %396 = dma.done.wait [#allocation3], 256  }
  0x12   :  { %397 = vsyncadd [#allocation3], 4294967040  ;;  %v401_v0 = vmov 0.0|0.0   ;;  %vm402_vm0 = vmmov 0   ;;  %v403_v1 = vmov 0.0   ;;  %v41_v2 = vld [vmem:[#allocation2] sm:$0xff] }
  0x13   :  { %351 = vmatprep.subr.bf16.mxu0 %v401_v0  ;;  %326 = vmatprep.mubr.msk.f32.mxu0 %vm402_vm0, %v403_v1  ;;  %v42_v3 = vld [vmem:[#allocation2 + $0x8] sm:$0xff]  ;;  %v125_v5 = vld [vmem:[%s501_s3] sm:$0xff]  ;;  %vm50_vm1 = vcmask 130048   ;;  %v127_v9 = vld [vmem:[%s501_s3 + $0x10] sm:$0xff]  ;;  %vm136_vm2 = vcmask 261120   ;;  %vm296_vm3 = vcmask 31744  }
  0x14   :  { %354 = vmatprep.subr.bf16.mxu1 %v401_v0  ;;  %337 = vmatprep.mubr.msk.f32.mxu1 %vm402_vm0, %v403_v1  ;;  %v352_v4 = vpack.c.bf16 %v42_v3, %v41_v2  ;;  %v126_v6 = vld [vmem:[%s501_s3 + $0x8] sm:$0xff]  ;;  %v40_v8 = vld [vmem:[%s498_s0] sm:$0xff]  ;;  %v128_v10 = vld [vmem:[%s501_s3 + $0x18] sm:$0xff] }
  0x15   :  { %v355_v7 = vpack.c.bf16 %v126_v6, %v125_v5  ;;  %v358_v11 = vpack.c.bf16 %v128_v10, %v127_v9  ;;  %v211_v12 = vld [vmem:[%s503_s5] sm:$0xff]  ;;  %v212_v13 = vld [vmem:[%s503_s5 + $0x8] sm:$0xff]  ;;  %v213_v20 = vld [vmem:[%s503_s5 + $0x10] sm:$0xff] }
  0x16   :  { %353 = vmatpush3.bf16.msra.mxu0 %v352_v4  ;;  %v361_v14 = vpack.c.bf16 %v212_v13, %v211_v12  ;;  %v303_v15 = vld [vmem:[%s500_s2] ss:$0 sm:$0xff]  ;;  %v214_v21 = vld [vmem:[%s503_s5 + $0x18] sm:$0xff] }
  0x17   :  { %356 = vmatpush3.bf16.msra.mxu1 %v355_v7  ;;  %360 = vmatprep.subr.bf16.mxu0 %v401_v0  ;;  %v364_v22 = vpack.c.bf16 %v214_v21, %v213_v20  ;;  %v305_v23 = vld [vmem:[%s502_s4] ss:$0 sm:$0xff] }
  0x18   :  { %357 = vmatprep.subr.bf16.mxu1 %v401_v0  ;;  %v307_v28 = vld [vmem:[%s504_s6] ss:$0 sm:$0xff] }
  0x19   :  { %327 = vmatmul.mubr.msk.f32.vlgmr.msra.gmra.mrb[0].mxu0 %vm50_vm1, %v40_v8 }
  0x1a   :  { %348 = vmatprep.mubr.msk.f32.mxu0 %vm402_vm0, %v403_v1  ;;  %362 = vmatpush3.bf16.msra.mxu0 %v361_v14 }
  0x1b   :  { %359 = vmatpush3.bf16.msra.mxu1 %v358_v11  ;;  %363 = vmatprep.subr.bf16.mxu0 %v401_v0 }
  0x1e   :  { %365 = vmatpush3.bf16.msra.mxu0 %v364_v22 }
  0xec   :  { %v120_v16 = vpop.f32.mrb[0].mxu0 }
  0xed   :  { %v121_v17 = vadd.f32 %v303_v15, %v120_v16  ;;  %v328_v18 = vpop.f32.mrb[1].mxu0 }
  0xef   :  { %v124_v19 = vmax.f32 %v121_v17, 0.0 }
  0xf1   :  { %338 = vmatmul.mubr.msk.f32.vlgmr.msra.gmra.mrb[0].mxu1 %vm136_vm2, %v124_v19 }
 0x1c4   :  { %v206_v24 = vpop.f32.mrb[0].mxu1 }
 0x1c5   :  { %v207_v25 = vadd.f32 %v305_v23, %v206_v24  ;;  %v339_v26 = vpop.f32.mrb[1].mxu1 }
 0x1c7   :  { %v210_v27 = vmax.f32 %v207_v25, 0.0 }
 0x1c9   :  { %349 = vmatmul.mubr.msk.f32.vlgmr.msra.gmra.mrb[2].mxu0 %vm136_vm2, %v210_v27 }
 0x29c   :  { %v291_v29 = vpop.f32.mrb[2].mxu0 }
 0x29d   :  { %v292_v30 = vadd.f32 %v307_v28, %v291_v29  ;;  %v350_v31 = vpop.f32.mrb[3].mxu0 }
 0x29f   :  { %372 = vtanh.f32 %v292_v30 }
 0x2a9   :  { %v373_v32 = vpop.eup %372 }
 0x2aa   :  { %297 = vst.msk [vmem:[%s505_s7] sm:$0xff] %vm296_vm3, %v373_v32 }
 0x2ab   :  { %302 = vsyncpa [#allocation3], 1 }

</bundles_post_ra>
